<compile_context>
chip_gen: v7x
topology: tpu7x:2x2x1
jax: 0.10.0
libtpu: 0.0.40
codegen_flags: <defaults>
</compile_context>

<pallas_src>
import functools
import math

import jax
import jax.numpy as jnp
from jax import lax
from jax.experimental import pallas as pl
from jax.experimental.pallas import tpu as pltpu

_LANES = 128
_SUBLANES = 8
_MAX_TM = 8192   # rows per block: (8192, 128) f32 = 4 MiB per input block
_CHUNK = 512     # rows per inner compute chunk (bounds live VMEM temporaries)


def _round_up(x, m):
    return ((x + m - 1) // m) * m


def _kernel(yh_ref, yt_ref, out_ref, acc_ref, *,
            rows, tm, chunk, blocks_per_split, needs_mask):
    p = pl.program_id(0)   # partial-sum split (parallel axis; 2-TC on v7x)
    j = pl.program_id(1)   # sequential reduction over row-blocks

    @pl.when(j == 0)
    def _():
        acc_ref[...] = jnp.zeros_like(acc_ref)

    # Intended first global row of this block. For padded trailing blocks this
    # is >= rows, so the mask below zeroes them regardless of what the clamped
    # DMA actually fetched.
    base_row = (p * blocks_per_split + j) * tm

    if needs_mask:
        row_iota = lax.broadcasted_iota(jnp.int32, (chunk, _LANES), 0)

    def body(c, carry):
        r0 = pl.multiple_of(c * chunk, chunk)
        yh = yh_ref[pl.ds(r0, chunk), :].astype(jnp.float32)
        yt = yt_ref[pl.ds(r0, chunk), :].astype(jnp.float32)
        # torch.clamp(y_hat, 1, inf) == max(y_hat, 1)
        d = jnp.log(jnp.maximum(yh, 1.0)) - jnp.log(yt)
        sq = d * d
        if needs_mask:
            rid = row_iota + (base_row + r0)
            sq = jnp.where(rid < rows, sq, 0.0)
        # Fold the chunk into a single-vreg (8,128) partial: groups of 8 rows
        # align exactly with native f32 tiles, so this is pure VPU adds.
        return carry + sq.reshape(chunk // _SUBLANES, _SUBLANES, _LANES).sum(axis=0)

    partial = lax.fori_loop(0, tm // chunk, body,
                            jnp.zeros((_SUBLANES, _LANES), jnp.float32))
    acc_ref[...] += partial

    @pl.when(j == pl.num_programs(1) - 1)
    def _():
        out_ref[0] = acc_ref[...]


def log_mse_loss(y_hat, y, *, max_tm=_MAX_TM, num_partials=2):
    """Pallas log-RMSE: equivalent to the PyTorch logmseloss.forward."""
    assert y_hat.shape == y.shape, "y_hat and y must have the same shape"
    n_total = int(math.prod(y_hat.shape)) if y_hat.shape else 1
    assert n_total > 0

    # Stream the native dtype; the cast to f32 happens in-kernel (halves HBM
    # traffic for bf16 inputs). Unusual dtypes fall back to f32.
    if y_hat.dtype not in (jnp.float32, jnp.bfloat16):
        y_hat = y_hat.astype(jnp.float32)
    if y.dtype not in (jnp.float32, jnp.bfloat16):
        y = y.astype(jnp.float32)

    yh_flat = jnp.reshape(y_hat, (-1,))
    yt_flat = jnp.reshape(y, (-1,))

    # Lane-dense view: (rows, 128). Only a ragged last lane-row (< 128 elems)
    # is padded (value 1 -> log(1)-log(1) == 0); no whole-array padded copies.
    rows = pl.cdiv(n_total, _LANES)
    pad = rows * _LANES - n_total
    if pad:
        yh_flat = jnp.concatenate([yh_flat, jnp.ones((pad,), yh_flat.dtype)])
        yt_flat = jnp.concatenate([yt_flat, jnp.ones((pad,), yt_flat.dtype)])
    yh2 = yh_flat.reshape(rows, _LANES)
    yt2 = yt_flat.reshape(rows, _LANES)

    # Block rows (tm): one (possibly partial) block for small inputs, otherwise
    # max_tm-row blocks. Always a multiple of the inner chunk and of 16 (bf16 tile).
    if rows <= _CHUNK:
        tm = _round_up(rows, 16)
    elif rows <= max_tm:
        tm = _round_up(rows, _CHUNK)
    else:
        tm = max_tm
    chunk = min(_CHUNK, tm)
    assert tm % chunk == 0 and tm % 16 == 0

    n_blocks = pl.cdiv(rows, tm)
    num_partials = num_partials if n_blocks >= 2 else 1
    blocks_per_split = pl.cdiv(n_blocks, num_partials)
    needs_mask = (num_partials * blocks_per_split * tm) != rows

    def in_map(p, j):
        # Clamp padded trailing block indices; their contribution is masked to 0.
        return (jnp.minimum(p * blocks_per_split + j, n_blocks - 1), 0)

    kernel = functools.partial(
        _kernel, rows=rows, tm=tm, chunk=chunk,
        blocks_per_split=blocks_per_split, needs_mask=needs_mask)

    partials = pl.pallas_call(
        kernel,
        out_shape=jax.ShapeDtypeStruct((num_partials, _SUBLANES, _LANES), jnp.float32),
        grid_spec=pltpu.PrefetchScalarGridSpec(
            num_scalar_prefetch=0,
            grid=(num_partials, blocks_per_split),
            in_specs=[
                pl.BlockSpec((tm, _LANES), in_map),
                pl.BlockSpec((tm, _LANES), in_map),
            ],
            out_specs=pl.BlockSpec((1, _SUBLANES, _LANES), lambda p, j: (p, 0, 0)),
            scratch_shapes=[pltpu.VMEM((_SUBLANES, _LANES), jnp.float32)],
        ),
        compiler_params=pltpu.CompilerParams(
            dimension_semantics=("parallel", "arbitrary"),
            # Need ~18 MiB at tm=8192 f32 (2 inputs x 2 buffers + small temps);
            # 32 MiB cap is safe on every generation incl. v7x (64 MiB physical).
            vmem_limit_bytes=32 * 1024 * 1024,
        ),
    )(yh2, yt2)

    # Combine per-core partial sums, mean over TRUE element count, sqrt.
    return jnp.sqrt(jnp.sum(partials) / n_total)


if __name__ == "__main__":
    key = jax.random.PRNGKey(0)
    k1, k2, k3, k4, k5, k6 = jax.random.split(key, 6)

    def _ref(y_hat, y):
        yh = y_hat.astype(jnp.float32)
        yt = y.astype(jnp.float32)
        return jnp.sqrt(jnp.mean((jnp.log(jnp.clip(yh, 1.0)) - jnp.log(yt)) ** 2))

    # Case 1: house-prices-like (64, 1) predictions/labels; some preds < 1
    # exercise the clamp path; single partial block + in-kernel tail mask.
    N, F = 64, 1
    y = jax.random.uniform(k1, (N, F), jnp.float32, minval=50.0, maxval=500.0)
    noise = jax.random.normal(k2, (N, F), jnp.float32) * 20.0
    y_hat = jnp.maximum(y + noise, 0.5)
    loss = log_mse_loss(y_hat, y)
    jax.block_until_ready(loss)
    ref = _ref(y_hat, y)
    assert jnp.allclose(loss, ref, rtol=1e-4, atol=1e-6), (loss, ref)

    # Case 2: N not a multiple of 128 -> ragged last lane-row + row mask.
    N2 = 300
    y2 = jax.random.uniform(k3, (N2, 1), jnp.float32, minval=10.0, maxval=900.0)
    noise2 = jax.random.normal(k4, (N2, 1), jnp.float32) * 30.0
    y_hat2 = jnp.maximum(y2 + noise2, 0.5)
    loss2 = log_mse_loss(y_hat2, y2)
    jax.block_until_ready(loss2)
    ref2 = _ref(y_hat2, y2)
    assert jnp.allclose(loss2, ref2, rtol=1e-4, atol=1e-6), (loss2, ref2)

    # Case 3: bf16 inputs, multi-block reduction, 2-way partial-sum split and
    # clamped padded trailing blocks (small max_tm so the general path is
    # exercised at a small problem size).
    N3 = 70_000
    y3 = jax.random.uniform(k5, (N3,), jnp.float32, minval=5.0, maxval=1000.0)
    y_hat3 = jnp.maximum(y3 + jax.random.normal(k6, (N3,), jnp.float32) * 25.0, 0.5)
    y3_b, y_hat3_b = y3.astype(jnp.bfloat16), y_hat3.astype(jnp.bfloat16)
    loss3 = log_mse_loss(y_hat3_b, y3_b, max_tm=64, num_partials=2)
    jax.block_until_ready(loss3)
    ref3 = _ref(y_hat3_b, y3_b)
    assert jnp.allclose(loss3, ref3, rtol=1e-3, atol=1e-5), (loss3, ref3)

    print("KERNEL_OK")
</pallas_src>

<mosaic_0001>
module attributes {stable_mosaic.version = 11 : i64} {
  func.func @_kernel(%arg0: i32, %arg1: i32, %arg2: memref<16x128xf32, #tpu.memory_space<vmem>>, %arg3: memref<16x128xf32, #tpu.memory_space<vmem>>, %arg4: memref<1x8x128xf32, #tpu.memory_space<vmem>>, %arg5: memref<8x128xf32, #tpu.memory_space<vmem>>) attributes {dimension_semantics = [#tpu.dimension_semantics<parallel>, #tpu.dimension_semantics<arbitrary>], iteration_bounds = array<i64: 1, 1>, scalar_prefetch = 0 : i64, scratch_operands = 1 : i64, tpu.core_type = #tpu.core_type<tc>, window_params = [{transform_indices = @transform_0, window_bounds = array<i64: 16, 128>}, {transform_indices = @transform_1, window_bounds = array<i64: 16, 128>}, {transform_indices = @transform_2, window_bounds = array<i64: 1, 8, 128>}]} {
    %c0_i32 = arith.constant 0 : i32
    %0 = arith.cmpi eq, %arg1, %c0_i32 : i32
    %1 = arith.extui %0 : i1 to i32
    %c0_i32_0 = arith.constant 0 : i32
    %2 = arith.cmpi ne, %1, %c0_i32_0 : i32
    scf.if %2 {
      %cst_15 = arith.constant 0.000000e+00 : f32
      %36 = vector.broadcast %cst_15 : f32 to vector<8x128xf32>
      %c0_16 = arith.constant 0 : index
      %c0_17 = arith.constant 0 : index
      %37 = vector.load %arg5[%c0_16, %c0_17] : memref<8x128xf32, #tpu.memory_space<vmem>>, vector<8x128xf32>
      tpu.vector_store %arg5[%c0_16, %c0_17], %36 {strides = array<i32>} : memref<8x128xf32, #tpu.memory_space<vmem>>, vector<8x128xf32>,
    } else {
    }
    %c1_i32 = arith.constant 1 : i32
    %3 = arith.muli %arg0, %c1_i32 : i32
    %4 = arith.addi %3, %arg1 : i32
    %c16_i32 = arith.constant 16 : i32
    %5 = arith.muli %4, %c16_i32 : i32
    %6 = tpu.iota {dimensions = array<i32: 0>} : vector<16x128xi32>
    %cst = arith.constant 0.000000e+00 : f32
    %7 = vector.broadcast %cst : f32 to vector<8x128xf32>
    %c0_i32_1 = arith.constant 0 : i32
    %c16_i32_2 = arith.constant 16 : i32
    %8 = arith.muli %c0_i32_1, %c16_i32_2 : i32
    %9 = tpu.assume_multiple %8, 16 : i32
    %10 = arith.index_cast %9 : i32 to index
    %c0 = arith.constant 0 : index
    %11 = vector.load %arg2[%10, %c0] : memref<16x128xf32, #tpu.memory_space<vmem>>, vector<16x128xf32>
    %12 = arith.index_cast %9 : i32 to index
    %c0_3 = arith.constant 0 : index
    %13 = vector.load %arg3[%12, %c0_3] : memref<16x128xf32, #tpu.memory_space<vmem>>, vector<16x128xf32>
    %cst_4 = arith.constant 1.000000e+00 : f32
    %14 = vector.broadcast %cst_4 : f32 to vector<16x128xf32>
    %15 = arith.maximumf %11, %14 : vector<16x128xf32>
    %16 = math.log %15 : vector<16x128xf32>
    %17 = math.log %13 : vector<16x128xf32>
    %18 = arith.subf %16, %17 : vector<16x128xf32>
    %19 = arith.mulf %18, %18 : vector<16x128xf32>
    %20 = arith.addi %5, %9 : i32
    %21 = vector.broadcast %20 : i32 to vector<16x128xi32>
    %22 = arith.addi %6, %21 : vector<16x128xi32>
    %c1_i32_5 = arith.constant 1 : i32
    %23 = vector.broadcast %c1_i32_5 : i32 to vector<16x128xi32>
    %24 = arith.cmpi slt, %22, %23 : vector<16x128xi32>
    %cst_6 = arith.constant 0.000000e+00 : f32
    %25 = vector.broadcast %cst_6 : f32 to vector<16x128xf32>
    %26 = arith.select %24, %19, %25 : vector<16x128xi1>, vector<16x128xf32>
    %27 = vector.shape_cast %26 : vector<16x128xf32> to vector<2x8x128xf32>
    %cst_7 = arith.constant dense<0.000000e+00> : vector<8x128xf32>
    %28 = vector.multi_reduction <add>, %27, %cst_7 [0] : vector<2x8x128xf32> to vector<8x128xf32>
    %29 = arith.addf %7, %28 : vector<8x128xf32>
    %c1_i32_8 = arith.constant 1 : i32
    %c0_9 = arith.constant 0 : index
    %c0_10 = arith.constant 0 : index
    %30 = vector.load %arg5[%c0_9, %c0_10] : memref<8x128xf32, #tpu.memory_space<vmem>>, vector<8x128xf32>
    %31 = arith.addf %30, %29 : vector<8x128xf32>
    %c0_11 = arith.constant 0 : index
    %c0_12 = arith.constant 0 : index
    %32 = vector.load %arg5[%c0_11, %c0_12] : memref<8x128xf32, #tpu.memory_space<vmem>>, vector<8x128xf32>
    tpu.vector_store %arg5[%c0_11, %c0_12], %31 {strides = array<i32>} : memref<8x128xf32, #tpu.memory_space<vmem>>, vector<8x128xf32>,
    %c0_i32_13 = arith.constant 0 : i32
    %33 = arith.cmpi eq, %arg1, %c0_i32_13 : i32
    %34 = arith.extui %33 : i1 to i32
    %c0_i32_14 = arith.constant 0 : i32
    %35 = arith.cmpi ne, %34, %c0_i32_14 : i32
    scf.if %35 {
      %c0_15 = arith.constant 0 : index
      %c0_16 = arith.constant 0 : index
      %36 = vector.load %arg5[%c0_15, %c0_16] : memref<8x128xf32, #tpu.memory_space<vmem>>, vector<8x128xf32>
      %c0_17 = arith.constant 0 : index
      %c0_18 = arith.constant 0 : index
      %c0_19 = arith.constant 0 : index
      %37 = vector.load %arg4[%c0_17, %c0_18, %c0_19] : memref<1x8x128xf32, #tpu.memory_space<vmem>>, vector<1x8x128xf32>
      %38 = vector.shape_cast %37 : vector<1x8x128xf32> to vector<8x128xf32>
      %39 = vector.shape_cast %36 : vector<8x128xf32> to vector<1x8x128xf32>
      tpu.vector_store %arg4[%c0_17, %c0_18, %c0_19], %39 {strides = array<i32>} : memref<1x8x128xf32, #tpu.memory_space<vmem>>, vector<1x8x128xf32>,
    } else {
    }
    return
  }
  func.func @transform_0(%arg0: i32, %arg1: i32) -> (i32, i32) {
    %c1_i32 = arith.constant 1 : i32
    %0 = arith.muli %arg0, %c1_i32 : i32
    %1 = arith.addi %0, %arg1 : i32
    %c0_i32 = arith.constant 0 : i32
    %2 = arith.minsi %1, %c0_i32 : i32
    %c0_i32_0 = arith.constant 0 : i32
    %c0_i32_1 = arith.constant 0 : i32
    return %2, %c0_i32_0 : i32, i32
  }
  func.func @transform_1(%arg0: i32, %arg1: i32) -> (i32, i32) {
    %c1_i32 = arith.constant 1 : i32
    %0 = arith.muli %arg0, %c1_i32 : i32
    %1 = arith.addi %0, %arg1 : i32
    %c0_i32 = arith.constant 0 : i32
    %2 = arith.minsi %1, %c0_i32 : i32
    %c0_i32_0 = arith.constant 0 : i32
    %c0_i32_1 = arith.constant 0 : i32
    return %2, %c0_i32_0 : i32, i32
  }
  func.func @transform_2(%arg0: i32, %arg1: i32) -> (i32, i32, i32) {
    %c0_i32 = arith.constant 0 : i32
    %c0_i32_0 = arith.constant 0 : i32
    %c0_i32_1 = arith.constant 0 : i32
    return %arg0, %c0_i32, %c0_i32_0 : i32, i32, i32
  }
}

</mosaic_0001>

<bundles_post_ra>
// kernel: tpu_custom_call.1
= control target key start
LH: loop header
LB: loop body
LE: loop exit
PB: predicated region body
PF: predicated region fallthrough
CT: control target
= control target key end

     0   :  { %7 = vsyncpa [#allocation4], 0  ;;  %s248_s0 = inlined_call_operand.hbm [shape: f32[1,128], index: 0, kind: input, shape index: {}]   ;;  %s249_s1 = inlined_call_operand.vmem [shape: f32[1,128], index: 1, kind: input, shape index: {}]   ;;  %s250_s2 = inlined_call_operand.hbm [shape: f32[1,8,128], index: 2, kind: output, shape index: {}]  }
   0x1   :  { %8 = vsyncpa [#allocation5], 0 }
   0x2   :  { %19 = vsyncadd [#allocation4], 240  ;;  %s202_s9 = smov [#allocation3]   ;;  %s154_s13 = scalar_lea.hbm %s248_s0, 16 }
   0x3   :  { %s23_s10 = sshll.u32 %s202_s9, 4  ;;  %p155_p0 = scmp.ne.s32.totalorder %s248_s0, %s154_s13  ;;  %s24_s10 = int_to_ptr.vmem [resolvable:$true] %s23_s10 }
   0x4   :  { %p158_p1 = scmp.lt.u32.totalorder %s154_s13, %s248_s0 }
   0x6   :  { %p160_p2 = pnand %p158_p1, %p155_p0 }
   0x8   :  { %163 = shalt.err (!%p160_p2)
}
   0x9   :  { %s164_s18 = scalar_lea.vmem %s24_s10, 16  ;;  %s168_s19 = scalar_lea.vmem %s24_s10, 256 }
   0xa   :  { %p165_p3 = scmp.ne.s32.totalorder %s24_s10, %s164_s18  ;;  %p169_p4 = scmp.lt.s32.totalorder %s24_s10, %s24_s10 }
   0xb   :  { %p170_p5 = scmp.lt.s32.totalorder %s168_s19, %s164_s18 }
   0xd   :  { %p171_p6 = por %p170_p5, %p169_p4 }
   0xf   :  { %p172_p7 = pnand %p171_p6, %p165_p3 }
  0x11   :  { %175 = shalt.err (!%p172_p7)
}
  0x12   :  { %s203_s20 = smov 16   ;;  %s204_s21 = smov 1  }
  0x13   :  { %29 = dma.hbm_to_vmem [thread:$0]  %s248_s0, 16, %s24_s10, [#allocation4], %s203_s20, %s203_s20, %s204_s21  }
  0x14   :  { %198 = dma.done.wait [#allocation4], 256  }
  0x15   :  { %199 = vsyncadd [#allocation4], 4294967040  ;;  %v90_v0 = vld [vmem:[#allocation3] sm:$0xff]  ;;  %v87_v3 = vlaneseq  ;;  %s205_s26 = smov [#allocation6]  }
  0x16   :  { %v92_v1 = vld [vmem:[%s249_s1] sm:$0xff]  ;;  %v94_v2 = vmax.f32 %v90_v0, 1.0  ;;  %s132_s27 = sshll.u32 %s205_s26, 4  ;;  %s133_s27 = int_to_ptr.vmem [resolvable:$true] %s132_s27 }
  0x17   :  { %150 = vlog2.f32 %v92_v1  ;;  %v88_v7 = vshrl.u32 %v87_v3, 7  ;;  %s176_s0 = scalar_lea.vmem %s133_s27, 128  ;;  %p181_p9 = scmp.lt.s32.totalorder %s133_s27, %s133_s27 }
  0x18   :  { %152 = vlog2.f32 %v94_v2  ;;  %p177_p8 = scmp.ne.s32.totalorder %s133_s27, %s176_s0  ;;  %p182_p10 = scmp.lt.s32.totalorder %s176_s0, %s176_s0 }
  0x19   :  { %vm112_vm0 = vcmp.lt.s32.totalorder %v88_v7, 1 }
  0x1a   :  { %p183_p11 = por %p182_p10, %p181_p9 }
  0x1c   :  { %p184_p12 = pnand %p183_p11, %p177_p8 }
  0x21   :  { %v151_v4 = vpop.eup %150 }
  0x22   :  { %v101_v5 = vmul.f32 0.6931472, %v151_v4  ;;  %v153_v6 = vpop.eup %152 }
  0x23   :  { %v97_v8 = vmul.f32 0.6931472, %v153_v6 }
  0x25   :  { %v104_v9 = vsub.f32 %v97_v8, %v101_v5 }
  0x27   :  { %v106_v10 = vmul.f32 %v104_v9, %v104_v9 }
  0x29   :  { %v114_v11 = vsel %vm112_vm0, %v106_v10, 0.0 }
  0x2a   :  { %125 = vst [vmem:[#allocation6] sm:$0xff] %v114_v11 }
  0x2b   :  { %187 = shalt.err (!%p184_p12)
}
  0x2c   :  { %s188_s29 = scalar_lea.hbm %s250_s2, 128 }
  0x2d   :  { %p189_p13 = scmp.ne.s32.totalorder %s250_s2, %s188_s29  ;;  %p192_p0 = scmp.lt.u32.totalorder %s188_s29, %s250_s2 }
  0x2f   :  { %p194_p1 = pnand %p192_p0, %p189_p13 }
  0x31   :  { %197 = shalt.err (!%p194_p1)
}
  0x32   :  { %135 = dma.vmem_to_hbm [thread:$0]  %s133_s27, 128, %s250_s2, [#allocation5]  }
  0x33   :  { %200 = dma.done.wait [#allocation5], 128  }
  0x34   :  { %201 = vsyncadd [#allocation5], 4294967168 }
  0x35   :  { %139 = vsyncpa [#allocation4], 1 }
  0x36   :  { %140 = vsyncpa [#allocation5], 1 }

</bundles_post_ra>
